<compile_context>
chip_gen: v7x
topology: tpu7x:2x2x1
jax: 0.10.0
libtpu: 0.0.40
codegen_flags: <defaults>
</compile_context>

<pallas_src>
import functools
from math import sqrt

import jax
import jax.numpy as jnp
from jax import lax
from jax.experimental import pallas as pl
from jax.experimental.pallas import tpu as pltpu


# --------------------------------- kernel ------------------------------------
def attention_memory_bank_kernel(x_ref, mem_ref, out_ref, *, scale):
    x = x_ref[...]                                     # (TB, D) bf16 token tile
    w = mem_ref[...]                                   # (D,  M) bf16 memory bank

    # logits over memory slots: (TB, M) f32. Scale folded into the 2-vreg W tile
    # (not the 16+-vreg logits) — costless VALU saving.
    logits = jnp.dot(x, w * scale, preferred_element_type=jnp.float32)

    # softmax over the memory-slot axis (PyTorch softmax(dim=1) on (B, M, N)),
    # all element-wise math in f32.
    m = jnp.max(logits, axis=-1, keepdims=True)
    e = jnp.exp(logits - m)
    denom = jnp.sum(e, axis=-1, keepdims=True)
    attn = e * pl.reciprocal(denom, approx=True)       # EUP reciprocal, no VPU divide

    # out^T = W @ attn^T, expressed as dot_general contracting the LAST dims of both
    # operands: (D, M) x (TB, M) -> (D, TB). No explicit transpose/relayout, and the
    # result tile is lane-dense (last dim TB >= 128) -> unmasked vector stores.
    out_t = lax.dot_general(w, attn.astype(jnp.bfloat16),
                            (((1,), (1,)), ((), ())),
                            preferred_element_type=jnp.float32)
    out_ref[...] = out_t.astype(out_ref.dtype)


# ------------------------------ host-side glue --------------------------------
def _round_up(v, m):
    return -(-v // m) * m


def _choose_token_tile(bn, tokens_per_block):
    """Return (tile, grid_steps, padded_bn)."""
    if bn <= tokens_per_block:
        # Single grid step: no per-step pipeline overhead to amortize (v5e/v6e are
        # single-TC, so multiple steps would be a pure serial loop).
        tb = max(8, _round_up(bn, 8))
        return tb, 1, tb
    # Multi-step: tile must be a multiple of 128 so the lane-dense (D, tb) output
    # block satisfies the 128-lane constraint; prefer a divisor of bn (no host pad).
    start = max(128, (tokens_per_block // 128) * 128)
    for tb in range(start, 127, -128):
        if bn % tb == 0:
            return tb, bn // tb, bn
    tb = start
    g = pl.cdiv(bn, tb)
    return tb, g, g * tb


def attention_memory_bank(x, mem, *, tokens_per_block=512):
    """x: (B, N, D); mem: (1, D, M) parameter. Returns (B, N, D) float32."""
    B, N, D = x.shape
    _, Dm, M = mem.shape
    assert Dm == D
    BN = B * N

    # bf16 MXU operands (in a real model the producer would already emit bf16).
    xf = x.reshape(BN, D).astype(jnp.bfloat16)         # tokens-major, batch folded in
    w = mem[0].astype(jnp.bfloat16)                    # (D, M), shared across batch

    tb, g, padded_bn = _choose_token_tile(BN, tokens_per_block)
    if padded_bn != BN:
        # Zero token rows -> uniform softmax outputs, sliced off below.
        xf = jnp.pad(xf, ((0, padded_bn - BN), (0, 0)))

    kernel = functools.partial(attention_memory_bank_kernel, scale=1.0 / sqrt(D))
    out_t = pl.pallas_call(
        kernel,
        # Lane-dense transposed output: (D, padded_BN).
        out_shape=jax.ShapeDtypeStruct((D, padded_bn), jnp.float32),
        grid_spec=pltpu.PrefetchScalarGridSpec(
            num_scalar_prefetch=0,
            grid=(g,),
            in_specs=[
                pl.BlockSpec((tb, D), lambda i: (i, 0)),   # token tile
                pl.BlockSpec((D, M), lambda i: (0, 0)),    # full memory bank, resident
            ],
            out_specs=pl.BlockSpec((D, tb), lambda i: (0, i)),
        ),
        compiler_params=pltpu.CompilerParams(
            dimension_semantics=(("arbitrary",) if g == 1 else ("parallel",))),
    )(xf, w)

    # Cheap wrapper-side layout plumbing: (D, BN) -> (BN, D) -> (B, N, D).
    return out_t[:, :BN].T.reshape(B, N, D)


# ----------------------------- pure-JAX reference -----------------------------
def ref_forward(x, mem):
    B, N, D = x.shape
    w = mem[0]                                         # (D, M)
    m_key = w.T                                        # (M, D)
    hp = jax.lax.Precision.HIGHEST
    logits = jnp.einsum('md,bnd->bmn', m_key, x, precision=hp) / jnp.sqrt(jnp.float32(D))
    a = jax.nn.softmax(logits, axis=1)                 # softmax over memory slots (dim=1)
    x_new = jnp.einsum('dm,bmn->bdn', w, a, precision=hp)
    return jnp.transpose(x_new, (0, 2, 1))             # (B, N, D)


# ----------------------------------- main --------------------------------------
if __name__ == "__main__":
    key = jax.random.PRNGKey(0)
    kx, km = jax.random.split(key)

    B, N, D, M = 2, 128, 32, 128                       # dim=32, mem_size=128
    x = jax.random.normal(kx, (B, N, D), jnp.float32)
    mem = jax.random.normal(km, (1, D, M), jnp.float32)  # nn.Parameter.normal_(0, 1)

    out = attention_memory_bank(x, mem)
    jax.block_until_ready(out)

    ref = ref_forward(x, mem)
    assert out.shape == (B, N, D)
    err = float(jnp.max(jnp.abs(out - ref)))
    # Tolerance reflects bf16 MXU operands + approx EUP reciprocal vs the f32
    # HIGHEST-precision reference (precision contract chosen per review).
    assert jnp.allclose(out, ref, atol=3e-2, rtol=3e-2), err
    print("KERNEL_OK")
</pallas_src>

<mosaic_0001>
module attributes {stable_mosaic.version = 11 : i64} {
  func.func @attention_memory_bank_kernel(%arg0: i32, %arg1: memref<256x32xbf16, #tpu.memory_space<vmem>>, %arg2: memref<32x128xbf16, #tpu.memory_space<vmem>>, %arg3: memref<32x256xf32, #tpu.memory_space<vmem>>) attributes {dimension_semantics = [#tpu.dimension_semantics<arbitrary>], iteration_bounds = array<i64: 1>, scalar_prefetch = 0 : i64, scratch_operands = 0 : i64, tpu.core_type = #tpu.core_type<tc>, window_params = [{transform_indices = @transform_0, window_bounds = array<i64: 256, 32>}, {pipeline_mode = #tpu.pipeline_mode<synchronous>, transform_indices = @transform_1, window_bounds = array<i64: 32, 128>}, {transform_indices = @transform_2, window_bounds = array<i64: 32, 256>}]} {
    %c0 = arith.constant 0 : index
    %c0_0 = arith.constant 0 : index
    %0 = vector.load %arg1[%c0, %c0_0] : memref<256x32xbf16, #tpu.memory_space<vmem>>, vector<256x32xbf16>
    %c0_1 = arith.constant 0 : index
    %c0_2 = arith.constant 0 : index
    %1 = vector.load %arg2[%c0_1, %c0_2] : memref<32x128xbf16, #tpu.memory_space<vmem>>, vector<32x128xbf16>
    %cst = arith.constant 1.767580e-01 : bf16
    %2 = vector.broadcast %cst : bf16 to vector<32x128xbf16>
    %3 = arith.mulf %1, %2 : vector<32x128xbf16>
    %cst_3 = arith.constant dense<0.000000e+00> : vector<256x128xf32>
    %4 = tpu.matmul %0, %3, %cst_3 {dimension_numbers = #tpu.dot_dimension_numbers<[1], [0], [0], [1], [0, 0, 1, 1], [], []>} : vector<256x32xbf16>, vector<32x128xbf16>, vector<256x128xf32> -> vector<256x128xf32>
    %cst_4 = arith.constant dense<0xFF800000> : vector<256xf32>
    %5 = vector.multi_reduction <maximumf>, %4, %cst_4 [1] : vector<256x128xf32> to vector<256xf32>
    %6 = vector.shape_cast %5 : vector<256xf32> to vector<256x1xf32>
    %7 = vector.broadcast %6 : vector<256x1xf32> to vector<256x128xf32>
    %8 = arith.subf %4, %7 : vector<256x128xf32>
    %9 = math.exp %8 : vector<256x128xf32>
    %cst_5 = arith.constant dense<0.000000e+00> : vector<256xf32>
    %10 = vector.multi_reduction <add>, %9, %cst_5 [1] : vector<256x128xf32> to vector<256xf32>
    %11 = vector.shape_cast %10 : vector<256xf32> to vector<256x1xf32>
    %12 = tpu.reciprocal %11 {approx = true} : vector<256x1xf32> -> vector<256x1xf32>
    %13 = vector.broadcast %12 : vector<256x1xf32> to vector<256x128xf32>
    %14 = arith.mulf %9, %13 : vector<256x128xf32>
    %15 = arith.truncf %14 : vector<256x128xf32> to vector<256x128xbf16>
    %cst_6 = arith.constant dense<0.000000e+00> : vector<32x256xf32>
    %16 = tpu.matmul %1, %15, %cst_6 {dimension_numbers = #tpu.dot_dimension_numbers<[1], [1], [0], [0], [0, 0, 1, 0], [], []>} : vector<32x128xbf16>, vector<256x128xbf16>, vector<32x256xf32> -> vector<32x256xf32>
    %c0_7 = arith.constant 0 : index
    %c0_8 = arith.constant 0 : index
    %17 = vector.load %arg3[%c0_7, %c0_8] : memref<32x256xf32, #tpu.memory_space<vmem>>, vector<32x256xf32>
    tpu.vector_store %arg3[%c0_7, %c0_8], %16 {strides = array<i32>} : memref<32x256xf32, #tpu.memory_space<vmem>>, vector<32x256xf32>,
    return
  }
  func.func @transform_0(%arg0: i32) -> (i32, i32) {
    %c0_i32 = arith.constant 0 : i32
    %c0_i32_0 = arith.constant 0 : i32
    return %arg0, %c0_i32 : i32, i32
  }
  func.func @transform_1(%arg0: i32) -> (i32, i32) {
    %c0_i32 = arith.constant 0 : i32
    %c0_i32_0 = arith.constant 0 : i32
    %c0_i32_1 = arith.constant 0 : i32
    return %c0_i32, %c0_i32_0 : i32, i32
  }
  func.func @transform_2(%arg0: i32) -> (i32, i32) {
    %c0_i32 = arith.constant 0 : i32
    %c0_i32_0 = arith.constant 0 : i32
    return %c0_i32, %arg0 : i32, i32
  }
}

</mosaic_0001>

<bundles_post_ra>
// kernel: tpu_custom_call.1
= control target key start
LH: loop header
LB: loop body
LE: loop exit
PB: predicated region body
PF: predicated region fallthrough
CT: control target
= control target key end

     0   :  { %vm146_vm0 = vcmask 261120   ;;  %s1406_s0 = inlined_call_operand.vmem [shape: bf16[256,32], index: 0, kind: input, shape index: {}]   ;;  %s1407_s1 = inlined_call_operand.vmem [shape: bf16[32,128], index: 1, kind: input, shape index: {}]   ;;  %s1408_s2 = inlined_call_operand.hbm [shape: f32[32,256], index: 2, kind: output, shape index: {}]  }
   0x1   :  { %v1053_v0 = vld [vmem:[%s1407_s1] sm:$0xf]  ;;  %v1058_v1 = vld [vmem:[%s1407_s1 + $0x4] sm:$0xf]  ;;  %v1063_v2 = vld [vmem:[%s1407_s1 + $0x8] sm:$0xf] }
   0x2   :  { %v50_v3 = vmul.bf16 1043676725, %v1053_v0  ;;  %v51_v4 = vmul.bf16 1043676725, %v1058_v1  ;;  %v1070_v5 = vld [vmem:[%s1407_s1 + $0xc] sm:$0xf] }
   0x3   :  { %v52_v6 = vmul.bf16 1043676725, %v1063_v2  ;;  %v53_v7 = vmul.bf16 1043676725, %v1070_v5  ;;  %v862_v9 = vld [vmem:[%s1406_s0] sm:$0xff]   ;;  %v863_v11 = vld [vmem:[%s1406_s0 + $0x8] sm:$0xff]  }
   0x4   :  { %v765_v8 = vcombine.low %v50_v3, %v51_v4  ;;  %827 = vmatprep.mubr.msk.bf16.mxu0 %vm146_vm0, %v862_v9  ;;  %v864_v12 = vld [vmem:[%s1406_s0 + $0x10] sm:$0xff]   ;;  %v865_v13 = vld [vmem:[%s1406_s0 + $0x18] sm:$0xff]   ;;  %v866_v14 = vld [vmem:[%s1406_s0 + $0x20] sm:$0xff]  }
   0x5   :  { %v766_v10 = vcombine.low %v52_v6, %v53_v7 }
   0x6   :  { %823 = vmatprep.subr.bf16.mxu0 %v765_v8 }
   0x7   :  { %824 = vmatpush3.bf16.msra.mxu0 %v765_v8 }
   0x8   :  { %825 = vmatprep.subr.bf16.mxu0 %v766_v10 }
   0xb   :  { %826 = vmatpush3.bf16.msra.mxu0 %v766_v10 }
   0xe   :  { %828 = vmatmul.mubr.msk.bf16.vlgmr.msra.gmra.mrb[0].mxu0 %vm146_vm0, %v863_v11 }
   0xf   :  { %831 = vmatprep.mubr.msk.bf16.mxu0 %vm146_vm0, %v864_v12 }
  0x10   :  { %7 = vsyncpa [#allocation3], 0  ;;  %v867_v15 = vld [vmem:[%s1406_s0 + $0x28] sm:$0xff]   ;;  %v868_v16 = vld [vmem:[%s1406_s0 + $0x30] sm:$0xff]  }
  0x11   :  { %v869_v17 = vld [vmem:[%s1406_s0 + $0x38] sm:$0xff]   ;;  %v870_v18 = vld [vmem:[%s1406_s0 + $0x40] sm:$0xff]   ;;  %v871_v19 = vld [vmem:[%s1406_s0 + $0x48] sm:$0xff]  }
  0x12   :  { %v872_v20 = vld [vmem:[%s1406_s0 + $0x50] sm:$0xff]   ;;  %v873_v21 = vld [vmem:[%s1406_s0 + $0x58] sm:$0xff]   ;;  %v874_v22 = vld [vmem:[%s1406_s0 + $0x60] sm:$0xff]  }
  0x13   :  { %v875_v23 = vld [vmem:[%s1406_s0 + $0x68] sm:$0xff]   ;;  %v876_v24 = vld [vmem:[%s1406_s0 + $0x70] sm:$0xff]   ;;  %v877_v25 = vld [vmem:[%s1406_s0 + $0x78] sm:$0xff]   ;;  %s1032_s0 = smov [#allocation2]  }
  0x14   :  { %s738_s20 = sshll.u32 %s1032_s0, 4  ;;  %s739_s20 = int_to_ptr.vmem [resolvable:$true] %s738_s20 }
  0x15   :  { %s1008_s1 = scalar_lea.vmem %s739_s20, 1024  ;;  %p1013_p1 = scmp.lt.s32.totalorder %s739_s20, %s739_s20 }
  0x16   :  { %832 = vmatmul.mubr.msk.bf16.gmra.mrb[4].mxu0 %vm146_vm0, %v865_v13  ;;  %p1009_p0 = scmp.ne.s32.totalorder %s739_s20, %s1008_s1  ;;  %p1014_p2 = scmp.lt.s32.totalorder %s1008_s1, %s1008_s1 }
  0x17   :  { %835 = vmatprep.mubr.msk.bf16.mxu0 %vm146_vm0, %v866_v14 }
  0x18   :  { %p1015_p3 = por %p1014_p2, %p1013_p1 }
  0x1a   :  { %p1016_p4 = pnand %p1015_p3, %p1009_p0 }
  0x1e   :  { %836 = vmatmul.mubr.msk.bf16.gmra.mrb[8].mxu0 %vm146_vm0, %v867_v15 }
  0x1f   :  { %839 = vmatprep.mubr.msk.bf16.mxu0 %vm146_vm0, %v868_v16 }
  0x26   :  { %840 = vmatmul.mubr.msk.bf16.gmra.mrb[12].mxu0 %vm146_vm0, %v869_v17 }
  0x27   :  { %843 = vmatprep.mubr.msk.bf16.mxu0 %vm146_vm0, %v870_v18 }
  0x2e   :  { %844 = vmatmul.mubr.msk.bf16.gmra.mrb[16].mxu0 %vm146_vm0, %v871_v19 }
  0x2f   :  { %847 = vmatprep.mubr.msk.bf16.mxu0 %vm146_vm0, %v872_v20 }
  0x36   :  { %848 = vmatmul.mubr.msk.bf16.gmra.mrb[20].mxu0 %vm146_vm0, %v873_v21 }
  0x37   :  { %851 = vmatprep.mubr.msk.bf16.mxu0 %vm146_vm0, %v874_v22 }
  0x3e   :  { %852 = vmatmul.mubr.msk.bf16.gmra.mrb[24].mxu0 %vm146_vm0, %v875_v23 }
  0x3f   :  { %855 = vmatprep.mubr.msk.bf16.mxu0 %vm146_vm0, %v876_v24 }
  0x46   :  { %856 = vmatmul.mubr.msk.bf16.gmra.mrb[28].mxu0 %vm146_vm0, %v877_v25 }
  0xe1   :  { %v1138_v26 = vpop.f32.mrb[0].mxu0 }
  0xe2   :  { %v1140_v27 = vpop.f32.mrb[1].mxu0 }
  0xe3   :  { %356 = vmax.xlane.f32.xlu1 %v1140_v27  ;;  %v1143_v28 = vpop.f32.mrb[2].mxu0 }
  0xe4   :  { %v1145_v29 = vpop.f32.mrb[3].mxu0 }
  0xe7   :  { %358 = vmax.xlane.f32.xlu1 %v1145_v29 }
  0xe9   :  { %v1148_v30 = vpop.f32.mrb[4].mxu0 }
  0xea   :  { %v1150_v31 = vpop.f32.mrb[5].mxu0 }
  0xeb   :  { %v1152_v32 = vpop.f32.mrb[6].mxu0 }
  0xec   :  { %v1154_v33 = vpop.f32.mrb[7].mxu0 }
  0xf1   :  { %v1156_v34 = vpop.f32.mrb[8].mxu0 }
  0xf2   :  { %v1158_v35 = vpop.f32.mrb[9].mxu0 }
  0xf3   :  { %v1160_v36 = vpop.f32.mrb[10].mxu0 }
  0xf4   :  { %v1162_v37 = vpop.f32.mrb[11].mxu0 }
  0xf9   :  { %v1164_v38 = vpop.f32.mrb[12].mxu0 }
  0xfa   :  { %v1166_v39 = vpop.f32.mrb[13].mxu0 }
  0xfb   :  { %v1168_v40 = vpop.f32.mrb[14].mxu0 }
  0xfc   :  { %v1170_v41 = vpop.f32.mrb[15].mxu0 }
 0x101   :  { %v1172_v42 = vpop.f32.mrb[16].mxu0 }
 0x102   :  { %v293_v43 = vpop.f32.mrb[17].mxu0 }
 0x103   :  { %388 = vmax.xlane.f32.xlu0 %v293_v43  ;;  %v1174_v44 = vpop.f32.mrb[18].mxu0 }
 0x104   :  { %394 = vmax.xlane.f32.xlu1 %v1174_v44  ;;  %v296_v45 = vpop.f32.mrb[19].mxu0 }
 0x107   :  { %390 = vmax.xlane.f32.xlu0 %v296_v45 }
 0x108   :  { %362 = vmax.xlane.f32.xlu1 %v1143_v28 }
 0x109   :  { %v1178_v46 = vpop.f32.mrb[20].mxu0 }
 0x10a   :  { %v1180_v47 = vpop.f32.mrb[21].mxu0 }
 0x10b   :  { %392 = vmax.xlane.f32.xlu0 %v1172_v42  ;;  %v1183_v48 = vpop.f32.mrb[22].mxu0 }
 0x10c   :  { %v1185_v49 = vpop.f32.mrb[23].mxu0 }
 0x10d   :  { %398 = vmax.xlane.f32.xlu1 %v1185_v49 }
 0x10f   :  { %360 = vmax.xlane.f32.xlu0 %v1138_v26 }
 0x111   :  { %366 = vmax.xlane.f32.xlu1 %v1154_v33  ;;  %v1190_v50 = vpop.f32.mrb[24].mxu0 }
 0x112   :  { %v1192_v51 = vpop.f32.mrb[25].mxu0 }
 0x113   :  { %396 = vmax.xlane.f32.xlu0 %v1180_v47  ;;  %v1195_v52 = vpop.f32.mrb[26].mxu0 }
 0x114   :  { %v1197_v53 = vpop.f32.mrb[27].mxu0 }
 0x115   :  { %402 = vmax.xlane.f32.xlu1 %v1183_v48 }
 0x117   :  { %364 = vmax.xlane.f32.xlu0 %v1150_v31 }
 0x119   :  { %370 = vmax.xlane.f32.xlu1 %v1152_v32  ;;  %v1202_v54 = vpop.f32.mrb[28].mxu0 }
 0x11a   :  { %v1204_v55 = vpop.f32.mrb[29].mxu0 }
 0x11b   :  { %400 = vmax.xlane.f32.xlu0 %v1178_v46  ;;  %v1207_v56 = vpop.f32.mrb[30].mxu0 }
 0x11c   :  { %v1209_v57 = vpop.f32.mrb[31].mxu0 }
 0x11d   :  { %406 = vmax.xlane.f32.xlu1 %v1197_v53 }
 0x11f   :  { %368 = vmax.xlane.f32.xlu0 %v1148_v30 }
 0x121   :  { %374 = vmax.xlane.f32.xlu1 %v1162_v37 }
 0x123   :  { %404 = vmax.xlane.f32.xlu0 %v1192_v51 }
 0x125   :  { %410 = vmax.xlane.f32.xlu1 %v1195_v52 }
 0x127   :  { %372 = vmax.xlane.f32.xlu0 %v1158_v35 }
 0x129   :  { %378 = vmax.xlane.f32.xlu1 %v1160_v36 }
 0x12b   :  { %408 = vmax.xlane.f32.xlu0 %v1190_v50 }
 0x12d   :  { %414 = vmax.xlane.f32.xlu1 %v1209_v57 }
 0x12f   :  { %376 = vmax.xlane.f32.xlu0 %v1156_v34 }
 0x131   :  { %382 = vmax.xlane.f32.xlu1 %v1170_v41 }
 0x133   :  { %412 = vmax.xlane.f32.xlu0 %v1204_v55 }
 0x135   :  { %418 = vmax.xlane.f32.xlu1 %v1207_v56 }
 0x137   :  { %380 = vmax.xlane.f32.xlu0 %v1166_v39 }
 0x139   :  { %386 = vmax.xlane.f32.xlu1 %v1168_v40 }
 0x13b   :  { %416 = vmax.xlane.f32.xlu0 %v1202_v54 }
 0x13f   :  { %384 = vmax.xlane.f32.xlu0 %v1164_v38 }
 0x170   :  { %v357_v58 = vpop.xlane.xlu1 %356 }
 0x171   :  { %v420_v60 = vsub.f32 %v1140_v27, %v357_v58 }
 0x173   :  { %v452_v4 = vmul.f32 1.442695, %v420_v60 }
 0x174   :  { %v359_v59 = vpop.xlane.xlu1 %358 }
 0x175   :  { %v421_v6 = vsub.f32 %v1145_v29, %v359_v59 }
 0x177   :  { %v454_v11 = vmul.f32 1.442695, %v421_v6 }
 0x190   :  { %v389_v61 = vpop.xlane.xlu0 %388 }
 0x191   :  { %v436_v62 = vsub.f32 %v293_v43, %v389_v61  ;;  %v395_v63 = vpop.xlane.xlu1 %394 }
 0x192   :  { %v439_v12 = vsub.f32 %v1174_v44, %v395_v63 }
 0x193   :  { %v484_v3 = vmul.f32 1.442695, %v436_v62 }
 0x194   :  { %v391_v7 = vpop.xlane.xlu0 %390  ;;  %v490_v17 = vmul.f32 1.442695, %v439_v12 }
 0x195   :  { %880 = vpow2.f32 %v484_v3  ;;  %v437_v8 = vsub.f32 %v296_v45, %v391_v7  ;;  %v363_v9 = vpop.xlane.xlu1 %362 }
 0x196   :  { %882 = vpow2.f32 %v452_v4  ;;  %v423_v18 = vsub.f32 %v1143_v28, %v363_v9 }
 0x197   :  { %v486_v10 = vmul.f32 1.442695, %v437_v8 }
 0x198   :  { %v393_v13 = vpop.xlane.xlu0 %392  ;;  %v458_v24 = vmul.f32 1.442695, %v423_v18 }
 0x199   :  { %884 = vpow2.f32 %v486_v10  ;;  %v438_v14 = vsub.f32 %v1172_v42, %v393_v13 }
 0x19a   :  { %v399_v15 = vpop.xlane.xlu1 %398  ;;  %886 = vpow2.f32 %v454_v11 }
 0x19b   :  { %v488_v16 = vmul.f32 1.442695, %v438_v14  ;;  %v441_v25 = vsub.f32 %v1185_v49, %v399_v15 }
 0x19c   :  { %v361_v19 = vpop.xlane.xlu0 %360 }
 0x19d   :  { %888 = vpow2.f32 %v488_v16  ;;  %v422_v20 = vsub.f32 %v1138_v26, %v361_v19  ;;  %v494_v44 = vmul.f32 1.442695, %v441_v25 }
 0x19e   :  { %v367_v21 = vpop.xlane.xlu1 %366  ;;  %890 = vpow2.f32 %v490_v17 }
 0x19f   :  { %v1234_v22 = vpop.eup %880  ;;  %v456_v23 = vmul.f32 1.442695, %v422_v20  ;;  %v425_v45 = vsub.f32 %v1154_v33, %v367_v21 }
 0x1a0   :  { %v397_v27 = vpop.xlane.xlu0 %396  ;;  %548 = vadd.xlane.f32.xlu0 %v1234_v22  ;;  %v1239_v42 = vpop.eup %882 }
 0x1a1   :  { %892 = vpow2.f32 %v456_v23  ;;  %v440_v29 = vsub.f32 %v1180_v47, %v397_v27  ;;  %v462_v62 = vmul.f32 1.442695, %v425_v45 }
 0x1a2   :  { %v403_v28 = vpop.xlane.xlu1 %402  ;;  %894 = vpow2.f32 %v458_v24 }
 0x1a3   :  { %v1241_v43 = vpop.eup %884  ;;  %v492_v26 = vmul.f32 1.442695, %v440_v29  ;;  %v443_v63 = vsub.f32 %v1183_v48, %v403_v28 }
 0x1a4   :  { %v365_v58 = vpop.xlane.xlu0 %364  ;;  %516 = vadd.xlane.f32.xlu0 %v1239_v42  ;;  %550 = vadd.xlane.f32.xlu1 %v1241_v43  ;;  %v1247_v59 = vpop.eup %886 }
 0x1a5   :  { %896 = vpow2.f32 %v492_v26  ;;  %v424_v49 = vsub.f32 %v1150_v31, %v365_v58  ;;  %v498_v8 = vmul.f32 1.442695, %v443_v63 }
 0x1a6   :  { %v371_v47 = vpop.xlane.xlu1 %370  ;;  %898 = vpow2.f32 %v494_v44 }
 0x1a7   :  { %v1249_v60 = vpop.eup %888  ;;  %v460_v61 = vmul.f32 1.442695, %v424_v49  ;;  %v427_v9 = vsub.f32 %v1152_v32, %v371_v47 }
 0x1a8   :  { %v401_v3 = vpop.xlane.xlu0 %400  ;;  %552 = vadd.xlane.f32.xlu0 %v1249_v60  ;;  %518 = vadd.xlane.f32.xlu1 %v1247_v59  ;;  %v1255_v4 = vpop.eup %890 }
 0x1a9   :  { %900 = vpow2.f32 %v460_v61  ;;  %v442_v33 = vsub.f32 %v1178_v46, %v401_v3  ;;  %v466_v14 = vmul.f32 1.442695, %v427_v9 }
 0x1aa   :  { %v407_v31 = vpop.xlane.xlu1 %406  ;;  %902 = vpow2.f32 %v462_v62 }
 0x1ab   :  { %v1257_v6 = vpop.eup %892  ;;  %v496_v7 = vmul.f32 1.442695, %v442_v33  ;;  %v445_v15 = vsub.f32 %v1197_v53, %v407_v31 }
 0x1ac   :  { %v369_v10 = vpop.xlane.xlu0 %368  ;;  %520 = vadd.xlane.f32.xlu0 %v1257_v6  ;;  %554 = vadd.xlane.f32.xlu1 %v1255_v4  ;;  %v1263_v11 = vpop.eup %894 }
 0x1ad   :  { %904 = vpow2.f32 %v496_v7  ;;  %v426_v48 = vsub.f32 %v1148_v30, %v369_v10  ;;  %v502_v20 = vmul.f32 1.442695, %v445_v15 }
 0x1ae   :  { %v375_v46 = vpop.xlane.xlu1 %374  ;;  %906 = vpow2.f32 %v498_v8 }
 0x1af   :  { %v1265_v12 = vpop.eup %896  ;;  %v464_v13 = vmul.f32 1.442695, %v426_v48  ;;  %v429_v21 = vsub.f32 %v1162_v37, %v375_v46 }
 0x1b0   :  { %v405_v16 = vpop.xlane.xlu0 %404  ;;  %556 = vadd.xlane.f32.xlu0 %v1265_v12  ;;  %522 = vadd.xlane.f32.xlu1 %v1263_v11  ;;  %v1271_v17 = vpop.eup %898 }
 0x1b1   :  { %908 = vpow2.f32 %v464_v13  ;;  %v444_v32 = vsub.f32 %v1192_v51, %v405_v16  ;;  %v470_v29 = vmul.f32 1.442695, %v429_v21 }
 0x1b2   :  { %v411_v30 = vpop.xlane.xlu1 %410  ;;  %910 = vpow2.f32 %v466_v14 }
 0x1b3   :  { %v1273_v18 = vpop.eup %900  ;;  %v500_v19 = vmul.f32 1.442695, %v444_v32  ;;  %v447_v28 = vsub.f32 %v1195_v52, %v411_v30 }
 0x1b4   :  { %v373_v23 = vpop.xlane.xlu0 %372  ;;  %524 = vadd.xlane.f32.xlu0 %v1273_v18  ;;  %558 = vadd.xlane.f32.xlu1 %v1271_v17  ;;  %v1279_v24 = vpop.eup %902 }
 0x1b5   :  { %912 = vpow2.f32 %v500_v19  ;;  %v428_v53 = vsub.f32 %v1158_v35, %v373_v23  ;;  %v506_v49 = vmul.f32 1.442695, %v447_v28 }
 0x1b6   :  { %v379_v51 = vpop.xlane.xlu1 %378  ;;  %914 = vpow2.f32 %v502_v20 }
 0x1b7   :  { %v1281_v25 = vpop.eup %904  ;;  %v468_v27 = vmul.f32 1.442695, %v428_v53  ;;  %v431_v47 = vsub.f32 %v1160_v36, %v379_v51 }
 0x1b8   :  { %v409_v26 = vpop.xlane.xlu0 %408  ;;  %560 = vadd.xlane.f32.xlu0 %v1281_v25  ;;  %526 = vadd.xlane.f32.xlu1 %v1279_v24  ;;  %v1287_v44 = vpop.eup %906 }
 0x1b9   :  { %916 = vpow2.f32 %v468_v27  ;;  %v446_v37 = vsub.f32 %v1190_v50, %v409_v26  ;;  %v474_v33 = vmul.f32 1.442695, %v431_v47  ;;  %v1356_v47 = vcombine.low %v1053_v0, %v1058_v1 }
 0x1ba   :  { %v415_v35 = vpop.xlane.xlu1 %414  ;;  %918 = vpow2.f32 %v470_v29 }
 0x1bb   :  { %v1289_v45 = vpop.eup %908  ;;  %v504_v58 = vmul.f32 1.442695, %v446_v37  ;;  %v449_v31 = vsub.f32 %v1209_v57, %v415_v35  ;;  %819 = vmatprep.mubr.bf16.mxu1 %v1356_v47 }
 0x1bc   :  { %v377_v61 = vpop.xlane.xlu0 %376  ;;  %528 = vadd.xlane.f32.xlu0 %v1289_v45  ;;  %562 = vadd.xlane.f32.xlu1 %v1287_v44  ;;  %v1295_v62 = vpop.eup %910 }
 0x1bd   :  { %920 = vpow2.f32 %v504_v58  ;;  %v430_v52 = vsub.f32 %v1156_v34, %v377_v61  ;;  %v510_v10 = vmul.f32 1.442695, %v449_v31 }
 0x1be   :  { %v383_v50 = vpop.xlane.xlu1 %382  ;;  %922 = vpow2.f32 %v506_v49 }
 0x1bf   :  { %v1297_v63 = vpop.eup %912  ;;  %v472_v3 = vmul.f32 1.442695, %v430_v52  ;;  %v433_v48 = vsub.f32 %v1170_v41, %v383_v50 }
 0x1c0   :  { %564 = vadd.xlane.f32.xlu0 %v1297_v63  ;;  %v413_v36 = vpop.xlane.xlu0 %412  ;;  %530 = vadd.xlane.f32.xlu1 %v1295_v62  ;;  %v1303_v8 = vpop.eup %914 }
 0x1c1   :  { %924 = vpow2.f32 %v472_v3  ;;  %v448_v7 = vsub.f32 %v1204_v55, %v413_v36  ;;  %v478_v16 = vmul.f32 1.442695, %v433_v48 }
 0x1c2   :  { %926 = vpow2.f32 %v474_v33  ;;  %v419_v46 = vpop.xlane.xlu1 %418 }
 0x1c3   :  { %v1305_v34 = vpop.eup %916  ;;  %v508_v9 = vmul.f32 1.442695, %v448_v7  ;;  %v451_v32 = vsub.f32 %v1207_v56, %v419_v46 }
 0x1c4   :  { %532 = vadd.xlane.f32.xlu0 %v1305_v34  ;;  %v381_v57 = vpop.xlane.xlu0 %380  ;;  %566 = vadd.xlane.f32.xlu1 %v1303_v8  ;;  %v1311_v14 = vpop.eup %918 }
 0x1c5   :  { %928 = vpow2.f32 %v508_v9  ;;  %v432_v13 = vsub.f32 %v1166_v39, %v381_v57  ;;  %v514_v23 = vmul.f32 1.442695, %v451_v32 }
 0x1c6   :  { %930 = vpow2.f32 %v510_v10  ;;  %v387_v39 = vpop.xlane.xlu1 %386 }
 0x1c7   :  { %v1313_v55 = vpop.eup %920  ;;  %v476_v15 = vmul.f32 1.442695, %v432_v13  ;;  %v435_v56 = vsub.f32 %v1168_v40, %v387_v39 }
 0x1c8   :  { %568 = vadd.xlane.f32.xlu0 %v1313_v55  ;;  %v417_v41 = vpop.xlane.xlu0 %416  ;;  %534 = vadd.xlane.f32.xlu1 %v1311_v14  ;;  %v1319_v19 = vpop.eup %922 }
 0x1c9   :  { %932 = vpow2.f32 %v476_v15  ;;  %v450_v30 = vsub.f32 %v1202_v54, %v417_v41  ;;  %v482_v28 = vmul.f32 1.442695, %v435_v56 }
 0x1ca   :  { %934 = vpow2.f32 %v478_v16 }
 0x1cb   :  { %v1321_v20 = vpop.eup %924  ;;  %v512_v21 = vmul.f32 1.442695, %v450_v30 }
 0x1cc   :  { %536 = vadd.xlane.f32.xlu0 %v1321_v20  ;;  %v385_v53 = vpop.xlane.xlu0 %384  ;;  %570 = vadd.xlane.f32.xlu1 %v1319_v19  ;;  %v1327_v27 = vpop.eup %926 }
 0x1cd   :  { %936 = vpow2.f32 %v512_v21  ;;  %v434_v51 = vsub.f32 %v1164_v38, %v385_v53 }
 0x1ce   :  { %938 = vpow2.f32 %v514_v23 }
 0x1cf   :  { %v1329_v54 = vpop.eup %928  ;;  %v480_v29 = vmul.f32 1.442695, %v434_v51 }
 0x1d0   :  { %572 = vadd.xlane.f32.xlu0 %v1329_v54  ;;  %538 = vadd.xlane.f32.xlu1 %v1327_v27  ;;  %v1333_v26 = vpop.eup %930 }
 0x1d1   :  { %940 = vpow2.f32 %v480_v29 }
 0x1d2   :  { %942 = vpow2.f32 %v482_v28 }
 0x1d3   :  { %v1335_v37 = vpop.eup %932 }
 0x1d4   :  { %540 = vadd.xlane.f32.xlu0 %v1335_v37  ;;  %574 = vadd.xlane.f32.xlu1 %v1333_v26  ;;  %v1339_v38 = vpop.eup %934 }
 0x1d7   :  { %v1341_v40 = vpop.eup %936 }
 0x1d8   :  { %576 = vadd.xlane.f32.xlu0 %v1341_v40  ;;  %542 = vadd.xlane.f32.xlu1 %v1339_v38  ;;  %v1345_v35 = vpop.eup %938 }
 0x1db   :  { %v1347_v58 = vpop.eup %940 }
 0x1dc   :  { %544 = vadd.xlane.f32.xlu0 %v1347_v58  ;;  %578 = vadd.xlane.f32.xlu1 %v1345_v35  ;;  %v1351_v49 = vpop.eup %942 }
 0x1e0   :  { %546 = vadd.xlane.f32.xlu1 %v1351_v49 }
 0x22d   :  { %v549_v61 = vpop.xlane.xlu0 %548 }
 0x22e   :  { %944 = vrcp.f32 %v549_v61 }
 0x231   :  { %v517_v52 = vpop.xlane.xlu0 %516  ;;  %v551_v50 = vpop.xlane.xlu1 %550 }
 0x232   :  { %946 = vrcp.f32 %v551_v50 }
 0x233   :  { %948 = vrcp.f32 %v517_v52 }
 0x235   :  { %v553_v3 = vpop.xlane.xlu0 %552  ;;  %v519_v33 = vpop.xlane.xlu1 %518 }
 0x236   :  { %950 = vrcp.f32 %v519_v33 }
 0x237   :  { %952 = vrcp.f32 %v553_v3 }
 0x238   :  { %v945_v7 = vpop.eup %944 }
 0x239   :  { %v521_v31 = vpop.xlane.xlu0 %520  ;;  %v555_v36 = vpop.xlane.xlu1 %554  ;;  %v628_v10 = vmul.f32 %v945_v7, %v1234_v22 }
 0x23a   :  { %954 = vrcp.f32 %v555_v36 }
 0x23b   :  { %956 = vrcp.f32 %v521_v31 }
 0x23c   :  { %v947_v9 = vpop.eup %946 }
 0x23d   :  { %v557_v0 = vpop.xlane.xlu0 %556  ;;  %v523_v1 = vpop.xlane.xlu1 %522  ;;  %v629_v48 = vmul.f32 %v947_v9, %v1241_v43 }
 0x23e   :  { %v949_v46 = vpop.eup %948  ;;  %958 = vrcp.f32 %v523_v1 }
 0x23f   :  { %v652_v57 = vpack.c.bf16 %v629_v48, %v628_v10  ;;  %960 = vrcp.f32 %v557_v0  ;;  %v612_v32 = vmul.f32 %v949_v46, %v1239_v42 }
 0x240   :  { %v951_v13 = vpop.eup %950 }
 0x241   :  { %v525_v15 = vpop.xlane.xlu0 %524  ;;  %v559_v16 = vpop.xlane.xlu1 %558  ;;  %803 = vmatprep.subr.bf16.mxu1 %v652_v57  ;;  %v613_v41 = vmul.f32 %v951_v13, %v1247_v59 }
 0x242   :  { %v953_v30 = vpop.eup %952  ;;  %962 = vrcp.f32 %v559_v16 }
 0x243   :  { %v644_v39 = vpack.c.bf16 %v613_v41, %v612_v32  ;;  %964 = vrcp.f32 %v525_v15  ;;  %v630_v43 = vmul.f32 %v953_v30, %v1249_v60 }
 0x244   :  { %v955_v21 = vpop.eup %954 }
 0x245   :  { %v561_v22 = vpop.xlane.xlu0 %560  ;;  %v527_v23 = vpop.xlane.xlu1 %526  ;;  %804 = vmatpush3.bf16.xpose.msra.mxu1 %v644_v39  ;;  %v631_v53 = vmul.f32 %v955_v21, %v1255_v4 }
 0x246   :  { %v957_v56 = vpop.eup %956  ;;  %966 = vrcp.f32 %v527_v23 }
 0x247   :  { %v653_v51 = vpack.c.bf16 %v631_v53, %v630_v43  ;;  %968 = vrcp.f32 %v561_v22  ;;  %v614_v59 = vmul.f32 %v957_v56, %v1257_v6 }
 0x248   :  { %v959_v29 = vpop.eup %958 }
 0x249   :  { %v529_v42 = vpop.xlane.xlu0 %528  ;;  %v563_v28 = vpop.xlane.xlu1 %562  ;;  %805 = vmatprep.subr.bf16.mxu1 %v653_v51  ;;  %v615_v61 = vmul.f32 %v959_v29, %v1263_v11 }
 0x24a   :  { %v961_v52 = vpop.eup %960  ;;  %970 = vrcp.f32 %v563_v28 }
 0x24b   :  { %v645_v50 = vpack.c.bf16 %v615_v61, %v614_v59  ;;  %972 = vrcp.f32 %v529_v42  ;;  %v632_v4 = vmul.f32 %v961_v52, %v1265_v12 }
 0x24c   :  { %v963_v3 = vpop.eup %962 }
 0x24d   :  { %v565_v60 = vpop.xlane.xlu0 %564  ;;  %v531_v33 = vpop.xlane.xlu1 %530  ;;  %806 = vmatpush3.bf16.xpose.msra.mxu1 %v645_v50  ;;  %v633_v31 = vmul.f32 %v963_v3, %v1271_v17 }
 0x24e   :  { %v965_v36 = vpop.eup %964  ;;  %974 = vrcp.f32 %v531_v33 }
 0x24f   :  { %v654_v7 = vpack.c.bf16 %v633_v31, %v632_v4  ;;  %976 = vrcp.f32 %v565_v60  ;;  %v616_v11 = vmul.f32 %v965_v36, %v1273_v18 }
 0x250   :  { %v967_v9 = vpop.eup %966 }
 0x251   :  { %v533_v6 = vpop.xlane.xlu0 %532  ;;  %v567_v0 = vpop.xlane.xlu1 %566  ;;  %807 = vmatprep.subr.bf16.mxu1 %v654_v7  ;;  %v617_v1 = vmul.f32 %v967_v9, %v1279_v24 }
 0x252   :  { %v969_v10 = vpop.eup %968  ;;  %978 = vrcp.f32 %v567_v0 }
 0x253   :  { %v646_v48 = vpack.c.bf16 %v617_v1, %v616_v11  ;;  %980 = vrcp.f32 %v533_v6  ;;  %v634_v17 = vmul.f32 %v969_v10, %v1281_v25 }
 0x254   :  { %v971_v46 = vpop.eup %970 }
 0x255   :  { %v569_v12 = vpop.xlane.xlu0 %568  ;;  %v535_v57 = vpop.xlane.xlu1 %534  ;;  %808 = vmatpush3.bf16.xpose.msra.mxu1 %v646_v48  ;;  %v635_v13 = vmul.f32 %v971_v46, %v1287_v44 }
 0x256   :  { %v973_v15 = vpop.eup %972  ;;  %982 = vrcp.f32 %v535_v57 }
 0x257   :  { %v655_v16 = vpack.c.bf16 %v635_v13, %v634_v17  ;;  %984 = vrcp.f32 %v569_v12  ;;  %v618_v24 = vmul.f32 %v973_v15, %v1289_v45 }
 0x258   :  { %v975_v32 = vpop.eup %974 }
 0x259   :  { %v537_v18 = vpop.xlane.xlu0 %536  ;;  %v571_v41 = vpop.xlane.xlu1 %570  ;;  %809 = vmatprep.subr.bf16.mxu1 %v655_v16  ;;  %v619_v30 = vmul.f32 %v975_v32, %v1295_v62 }
 0x25a   :  { %v977_v39 = vpop.eup %976  ;;  %986 = vrcp.f32 %v571_v41 }
 0x25b   :  { %v647_v21 = vpack.c.bf16 %v619_v30, %v618_v24  ;;  %988 = vrcp.f32 %v537_v18  ;;  %v636_v44 = vmul.f32 %v977_v39, %v1297_v63 }
 0x25c   :  { %v979_v22 = vpop.eup %978 }
 0x25d   :  { %v573_v25 = vpop.xlane.xlu0 %572  ;;  %v539_v23 = vpop.xlane.xlu1 %538  ;;  %810 = vmatpush3.bf16.xpose.msra.mxu1 %v647_v21  ;;  %v637_v43 = vmul.f32 %v979_v22, %v1303_v8 }
 0x25e   :  { %v981_v53 = vpop.eup %980  ;;  %990 = vrcp.f32 %v539_v23 }
 0x25f   :  { %v656_v56 = vpack.c.bf16 %v637_v43, %v636_v44  ;;  %992 = vrcp.f32 %v573_v25  ;;  %v620_v62 = vmul.f32 %v981_v53, %v1305_v34 }
 0x260   :  { %v983_v51 = vpop.eup %982 }
 0x261   :  { %v541_v45 = vpop.xlane.xlu0 %540  ;;  %v575_v29 = vpop.xlane.xlu1 %574  ;;  %811 = vmatprep.subr.bf16.mxu1 %v656_v56  ;;  %v621_v42 = vmul.f32 %v983_v51, %v1311_v14 }
 0x262   :  { %v985_v28 = vpop.eup %984  ;;  %994 = vrcp.f32 %v575_v29 }
 0x263   :  { %v648_v59 = vpack.c.bf16 %v621_v42, %v620_v62  ;;  %996 = vrcp.f32 %v541_v45  ;;  %v638_v8 = vmul.f32 %v985_v28, %v1313_v55 }
 0x264   :  { %v987_v61 = vpop.eup %986 }
 0x265   :  { %v577_v63 = vpop.xlane.xlu0 %576  ;;  %v543_v52 = vpop.xlane.xlu1 %542  ;;  %812 = vmatpush3.bf16.xpose.msra.mxu1 %v648_v59  ;;  %v639_v50 = vmul.f32 %v987_v61, %v1319_v19 }
 0x266   :  { %v989_v3 = vpop.eup %988  ;;  %998 = vrcp.f32 %v543_v52 }
 0x267   :  { %v657_v60 = vpack.c.bf16 %v639_v50, %v638_v8  ;;  %1000 = vrcp.f32 %v577_v63  ;;  %v622_v14 = vmul.f32 %v989_v3, %v1321_v20 }
 0x268   :  { %v991_v33 = vpop.eup %990 }
 0x269   :  { %v545_v34 = vpop.xlane.xlu0 %544  ;;  %v579_v4 = vpop.xlane.xlu1 %578  ;;  %813 = vmatprep.subr.bf16.mxu1 %v657_v60  ;;  %v623_v31 = vmul.f32 %v991_v33, %v1327_v27 }
 0x26a   :  { %v993_v36 = vpop.eup %992  ;;  %1002 = vrcp.f32 %v579_v4 }
 0x26b   :  { %1004 = vrcp.f32 %v545_v34  ;;  %v649_v7 = vpack.c.bf16 %v623_v31, %v622_v14  ;;  %v640_v19 = vmul.f32 %v993_v36, %v1329_v54 }
 0x26c   :  { %v995_v9 = vpop.eup %994 }
 0x26d   :  { %v547_v55 = vpop.xlane.xlu1 %546  ;;  %814 = vmatpush3.bf16.xpose.msra.mxu1 %v649_v7  ;;  %v641_v6 = vmul.f32 %v995_v9, %v1333_v26  ;;  %v997_v0 = vpop.eup %996 }
 0x26e   :  { %1006 = vrcp.f32 %v547_v55  ;;  %v624_v20 = vmul.f32 %v997_v0, %v1335_v37  ;;  %v784_v37 = vcombine.low %v1063_v2, %v1070_v5 }
 0x26f   :  { %v658_v11 = vpack.c.bf16 %v641_v6, %v640_v19 }
 0x270   :  { %v999_v1 = vpop.eup %998 }
 0x271   :  { %815 = vmatprep.subr.bf16.mxu1 %v658_v11  ;;  %v625_v27 = vmul.f32 %v999_v1, %v1339_v38  ;;  %v1001_v10 = vpop.eup %1000 }
 0x272   :  { %v642_v57 = vmul.f32 %v1001_v10, %v1341_v40 }
 0x273   :  { %v650_v48 = vpack.c.bf16 %v625_v27, %v624_v20 }
 0x274   :  { %v1003_v46 = vpop.eup %1002 }
 0x275   :  { %v1005_v12 = vpop.eup %1004  ;;  %816 = vmatpush3.bf16.xpose.msra.mxu1 %v650_v48  ;;  %v643_v17 = vmul.f32 %v1003_v46, %v1345_v35 }
 0x276   :  { %v626_v26 = vmul.f32 %v1005_v12, %v1347_v58 }
 0x277   :  { %v659_v13 = vpack.c.bf16 %v643_v17, %v642_v57 }
 0x278   :  { %v1007_v54 = vpop.eup %1006 }
 0x279   :  { %v627_v15 = vmul.f32 %v1007_v54, %v1351_v49  ;;  %817 = vmatprep.subr.bf16.mxu1 %v659_v13 }
 0x27b   :  { %v651_v16 = vpack.c.bf16 %v627_v15, %v626_v26 }
 0x27d   :  { %818 = vmatpush3.bf16.xpose.msra.mxu1 %v651_v16 }
 0x284   :  { %820 = vmatmul.mubr.bf16.vlgmr.msra.gmra.mrb[0].mxu1 %v1356_v47 }
 0x285   :  { %821 = vmatprep.mubr.bf16.mxu1 %v784_v37 }
 0x28c   :  { %822 = vmatmul.mubr.bf16.gmra.mrb[4].mxu1 %v784_v37 }
 0x357   :  { %v706_v38 = vpop.f32.mrb[0].mxu1 }
 0x358   :  { %725 = vst [vmem:[#allocation2] sm:$0xff] %v706_v38  ;;  %v708_v40 = vpop.f32.mrb[1].mxu1 }
 0x359   :  { %726 = vst [vmem:[#allocation2 + $0x8] sm:$0xff] %v708_v40  ;;  %v710_v35 = vpop.f32.mrb[2].mxu1 }
 0x35a   :  { %727 = vst [vmem:[#allocation2 + $0x10] sm:$0xff] %v710_v35  ;;  %v712_v32 = vpop.f32.mrb[3].mxu1 }
 0x35b   :  { %728 = vst [vmem:[#allocation2 + $0x18] sm:$0xff] %v712_v32 }
 0x35f   :  { %v716_v58 = vpop.f32.mrb[4].mxu1 }
 0x360   :  { %729 = vst [vmem:[#allocation2 + $0x20] sm:$0xff] %v716_v58  ;;  %v718_v49 = vpop.f32.mrb[5].mxu1 }
 0x361   :  { %730 = vst [vmem:[#allocation2 + $0x28] sm:$0xff] %v718_v49  ;;  %v720_v2 = vpop.f32.mrb[6].mxu1 }
 0x362   :  { %731 = vst [vmem:[#allocation2 + $0x30] sm:$0xff] %v720_v2  ;;  %v722_v5 = vpop.f32.mrb[7].mxu1 }
 0x363   :  { %732 = vst [vmem:[#allocation2 + $0x38] sm:$0xff] %v722_v5 }
 0x364   :  { %1019 = shalt.err (!%p1016_p4)
}
 0x365   :  { %s1020_s23 = scalar_lea.hbm %s1408_s2, 1024 }
 0x366   :  { %p1021_p5 = scmp.ne.s32.totalorder %s1408_s2, %s1020_s23  ;;  %p1024_p6 = scmp.lt.u32.totalorder %s1020_s23, %s1408_s2 }
 0x368   :  { %p1026_p7 = pnand %p1024_p6, %p1021_p5 }
 0x36a   :  { %1029 = shalt.err (!%p1026_p7)
}
 0x36b   :  { %s1033_s28 = smov 256   ;;  %s1034_s29 = smov 16  }
 0x36c   :  { %744 = dma.vmem_to_hbm [thread:$0]  %s739_s20, 1024, %s1408_s2, [#allocation3], %s1033_s28, %s1033_s28, %s1034_s29  }
 0x36d   :  { %1030 = dma.done.wait [#allocation3], 1024  }
 0x36e   :  { %1031 = vsyncadd [#allocation3], 4294966272 }
 0x36f   :  { %748 = vsyncpa [#allocation3], 1 }

</bundles_post_ra>
